<compile_context>
chip_gen: v7x
topology: tpu7x:2x2x1
jax: 0.10.0
libtpu: 0.0.40
codegen_flags: <defaults>
</compile_context>

<pallas_src>
import jax
import jax.numpy as jnp
from jax import lax
from jax.experimental import pallas as pl
from jax.experimental.pallas import tpu as pltpu


def _round_up(a, b):
    return (a + b - 1) // b * b


# ---------------------------------------------------------------------------
# Fused conv-matmul + bias + squash kernel
# ---------------------------------------------------------------------------
def _fused_caps_kernel(p_ref, w_ref, b_ref, g_ref, o_ref):
    # p_ref: (tm, Kw) im2col patches (bf16 or f32)
    # w_ref: (Kw, Cw) block-diagonal flattened conv weight
    # b_ref: (1, Cw)  f32 bias (tiled R times)
    # g_ref: (Cw, Cw) f32 0/1 group-sum matrix: g[i, j] = (i//dim == j//dim)
    # o_ref: (tm, Cw) f32 squashed capsule outputs
    acc = jnp.dot(p_ref[...], w_ref[...], preferred_element_type=jnp.float32)
    acc = acc + b_ref[...]
    # Per-capsule squared norm, broadcast back over each capsule's `dim`
    # columns via a tiny MXU matmul (keeps the tile 128-lane dense).
    n2 = jnp.dot(acc * acc, g_ref[...], preferred_element_type=jnp.float32)
    # squash scale = ||v||^2 / (1 + ||v||^2) / ||v||  (EUP rsqrt / reciprocal)
    scale = n2 * lax.rsqrt(n2 + 1e-12) * pl.reciprocal(1.0 + n2, approx=True)
    o_ref[...] = (acc * scale).astype(o_ref.dtype)


# ---------------------------------------------------------------------------
# Pallas wrapper: conv-as-matmul + bias + squash, lane-dense output
# ---------------------------------------------------------------------------
def _fused_conv_squash_pallas(patches, w_mat, bias, output_dim,
                              compute_dtype=jnp.bfloat16, tm=1024):
    M, K = patches.shape
    Cout = w_mat.shape[1]
    itemsize = jnp.dtype(compute_dtype).itemsize

    # Lane-widening factor: pack R original rows into one 128-lane-wide row.
    if Cout < 128 and 128 % Cout == 0:
        R = 128 // Cout
    else:
        R = 1
    Kw, Cw = R * K, R * Cout

    # Row tile (in wide rows): as large as fits a conservative VMEM budget.
    Mw_min = (M + R - 1) // R
    const_bytes = Kw * Cw * itemsize + Cw * Cw * 4 + Cw * 4
    per_row_bytes = 2 * Kw * itemsize + 2 * Cw * 4     # double-buffered in/out
    budget = 24 * 1024 * 1024 - const_bytes
    max_rows = max(8, (budget // per_row_bytes) // 8 * 8) if budget > 0 else 8
    tm_w = max(8, min(tm, _round_up(Mw_min, 8), max_rows))

    Mw = _round_up(Mw_min, tm_w)
    Mpad = Mw * R
    if Mpad != M:
        # Only the ragged tail is padded (zero rows: squash(eps) is NaN-free,
        # and they are sliced off below).
        patches = jnp.pad(patches, ((0, Mpad - M), (0, 0)))
    p_wide = patches.astype(compute_dtype).reshape(Mw, Kw)

    # Block-diagonal weight (Kw, Cw); identical to w_mat when R == 1.
    w_wide = jnp.kron(jnp.eye(R, dtype=w_mat.dtype), w_mat).astype(compute_dtype)
    b_wide = jnp.tile(bias.astype(jnp.float32).reshape(1, Cout), (1, R))
    grp = jnp.arange(Cw) // output_dim
    g = (grp[:, None] == grp[None, :]).astype(jnp.float32)

    out = pl.pallas_call(
        _fused_caps_kernel,
        out_shape=jax.ShapeDtypeStruct((Mw, Cw), jnp.float32),
        grid=(Mw // tm_w,),
        in_specs=[
            pl.BlockSpec((tm_w, Kw), lambda i: (i, 0)),
            pl.BlockSpec((Kw, Cw), lambda i: (0, 0)),
            pl.BlockSpec((1, Cw), lambda i: (0, 0)),
            pl.BlockSpec((Cw, Cw), lambda i: (0, 0)),
        ],
        out_specs=pl.BlockSpec((tm_w, Cw), lambda i: (i, 0)),
        compiler_params=pltpu.CompilerParams(
            dimension_semantics=("parallel",)),
    )(p_wide, w_wide, b_wide, g)

    # Undo the lane widening: pure row-major view back to (Mpad, Cout).
    return out.reshape(Mpad, Cout)[:M]


# ---------------------------------------------------------------------------
# Forward pass equivalent to PrimaryCapsLayer.forward (input NCHW)
# ---------------------------------------------------------------------------
def primary_caps_forward(x, weight, bias, output_caps, output_dim, stride,
                         compute_dtype=jnp.bfloat16, tm=1024):
    N, Cin, H, W = x.shape
    Cout, _, k, _ = weight.shape
    assert Cout == output_caps * output_dim
    Ho = (H - k) // stride + 1
    Wo = (W - k) // stride + 1

    # im2col with columns ordered (ki, kj, cin): one NHWC transpose of the
    # small input, then a single slice+concat (no transpose of the inflated
    # patch array).  Cast to compute_dtype early to halve the inflated bytes.
    x_nhwc = jnp.transpose(x, (0, 2, 3, 1)).astype(compute_dtype)
    cols = []
    for i in range(k):
        for j in range(k):
            cols.append(
                x_nhwc[:, i:i + stride * (Ho - 1) + 1:stride,
                          j:j + stride * (Wo - 1) + 1:stride, :]
            )
    patches = jnp.concatenate(cols, axis=-1)                # (N, Ho, Wo, k*k*Cin)
    patches = patches.reshape(N * Ho * Wo, k * k * Cin)     # (M, K)

    # Weight flattened to match the (ki, kj, cin) column ordering.
    w_mat = jnp.transpose(weight, (2, 3, 1, 0)).reshape(k * k * Cin, Cout)

    # Fused conv + bias + squash (Pallas, MXU).  Squash is order-invariant per
    # capsule vector, so it is applied before the capsule permutation.
    conv_sq = _fused_conv_squash_pallas(
        patches, w_mat, bias, output_dim,
        compute_dtype=compute_dtype, tm=tm)                 # (M, Cout), squashed

    # Match torch: view(N, caps, dim, H, W).permute(0,1,3,4,2).view(N, -1, dim)
    out = conv_sq.reshape(N, Ho, Wo, output_caps, output_dim)
    out = out.transpose(0, 3, 1, 2, 4)                      # (N, caps, Ho, Wo, dim)
    return out.reshape(N, output_caps * Ho * Wo, output_dim)


# ---------------------------------------------------------------------------
# Reference (pure JAX) for verification
# ---------------------------------------------------------------------------
def primary_caps_reference(x, weight, bias, output_caps, output_dim, stride):
    conv = lax.conv_general_dilated(
        x, weight, window_strides=(stride, stride), padding="VALID",
        dimension_numbers=("NCHW", "OIHW", "NCHW"),
    ) + bias[None, :, None, None]
    N, C, Ho, Wo = conv.shape
    out = conv.reshape(N, output_caps, output_dim, Ho, Wo)
    out = out.transpose(0, 1, 3, 4, 2).reshape(N, -1, output_dim)
    n2 = jnp.sum(out * out, axis=-1, keepdims=True)
    return out * (n2 / (1.0 + n2) / jnp.sqrt(n2))


# ---------------------------------------------------------------------------
if __name__ == "__main__":
    # PrimaryCapsLayer config:
    #   input_channels=4, output_caps=4, output_dim=8, kernel_size=9, stride=2
    #   input x: (N=2, Cin=4, H=16, W=16) -> conv out (2, 32, 4, 4)
    #   -> capsules (2, 4*4*4=64, 8)
    N, Cin, H, W = 2, 4, 16, 16
    output_caps, output_dim, kernel_size, stride = 4, 8, 9, 2
    Cout = output_caps * output_dim

    key = jax.random.PRNGKey(0)
    kx, kw, kb = jax.random.split(key, 3)
    x = jax.random.normal(kx, (N, Cin, H, W), dtype=jnp.float32)
    fan_in = Cin * kernel_size * kernel_size
    weight = jax.random.normal(kw, (Cout, Cin, kernel_size, kernel_size),
                               dtype=jnp.float32) * (1.0 / jnp.sqrt(fan_in))
    bias = jax.random.normal(kb, (Cout,), dtype=jnp.float32) * 0.01

    ref = jax.block_until_ready(
        primary_caps_reference(x, weight, bias, output_caps, output_dim, stride))

    # Default path: bf16 MXU inputs, f32 accumulation + f32 squash math.
    out = jax.block_until_ready(
        primary_caps_forward(x, weight, bias, output_caps, output_dim, stride))
    assert out.shape == (N, output_caps * 4 * 4, output_dim), out.shape
    err_bf16 = float(jnp.max(jnp.abs(out - ref)))
    assert jnp.allclose(out, ref, rtol=5e-2, atol=5e-2), err_bf16

    # Full f32 path for a tighter check of the fused kernel itself.
    out_f32 = jax.block_until_ready(
        primary_caps_forward(x, weight, bias, output_caps, output_dim, stride,
                             compute_dtype=jnp.float32))
    err_f32 = float(jnp.max(jnp.abs(out_f32 - ref)))
    assert jnp.allclose(out_f32, ref, rtol=1e-2, atol=1e-3), err_f32

    print("KERNEL_OK")
</pallas_src>

<mosaic_0001>
module attributes {stable_mosaic.version = 11 : i64} {
  func.func @_fused_caps_kernel(%arg0: i32, %arg1: memref<8x1296xbf16, #tpu.memory_space<vmem>>, %arg2: memref<1296x128xbf16, #tpu.memory_space<vmem>>, %arg3: memref<1x128xf32, #tpu.memory_space<vmem>>, %arg4: memref<128x128xf32, #tpu.memory_space<vmem>>, %arg5: memref<8x128xf32, #tpu.memory_space<vmem>>) attributes {dimension_semantics = [#tpu.dimension_semantics<parallel>], iteration_bounds = array<i64: 1>, scalar_prefetch = 0 : i64, scratch_operands = 0 : i64, tpu.core_type = #tpu.core_type<tc>, window_params = [{transform_indices = @transform_0, window_bounds = array<i64: 8, 1296>}, {pipeline_mode = #tpu.pipeline_mode<synchronous>, transform_indices = @transform_1, window_bounds = array<i64: 1296, 128>}, {pipeline_mode = #tpu.pipeline_mode<synchronous>, transform_indices = @transform_2, window_bounds = array<i64: 1, 128>}, {pipeline_mode = #tpu.pipeline_mode<synchronous>, transform_indices = @transform_3, window_bounds = array<i64: 128, 128>}, {transform_indices = @transform_4, window_bounds = array<i64: 8, 128>}]} {
    %c0 = arith.constant 0 : index
    %c0_0 = arith.constant 0 : index
    %0 = vector.load %arg1[%c0, %c0_0] : memref<8x1296xbf16, #tpu.memory_space<vmem>>, vector<8x1296xbf16>
    %c0_1 = arith.constant 0 : index
    %c0_2 = arith.constant 0 : index
    %1 = vector.load %arg2[%c0_1, %c0_2] : memref<1296x128xbf16, #tpu.memory_space<vmem>>, vector<1296x128xbf16>
    %cst = arith.constant dense<0.000000e+00> : vector<8x128xf32>
    %2 = tpu.matmul %0, %1, %cst {dimension_numbers = #tpu.dot_dimension_numbers<[1], [0], [0], [1], [0, 0, 1, 1], [], []>} : vector<8x1296xbf16>, vector<1296x128xbf16>, vector<8x128xf32> -> vector<8x128xf32>
    %c0_3 = arith.constant 0 : index
    %c0_4 = arith.constant 0 : index
    %3 = vector.load %arg3[%c0_3, %c0_4] : memref<1x128xf32, #tpu.memory_space<vmem>>, vector<1x128xf32>
    %4 = vector.broadcast %3 : vector<1x128xf32> to vector<8x128xf32>
    %5 = arith.addf %2, %4 : vector<8x128xf32>
    %6 = arith.mulf %5, %5 : vector<8x128xf32>
    %c0_5 = arith.constant 0 : index
    %c0_6 = arith.constant 0 : index
    %7 = vector.load %arg4[%c0_5, %c0_6] : memref<128x128xf32, #tpu.memory_space<vmem>>, vector<128x128xf32>
    %cst_7 = arith.constant dense<0.000000e+00> : vector<8x128xf32>
    %8 = tpu.matmul %6, %7, %cst_7 {dimension_numbers = #tpu.dot_dimension_numbers<[1], [0], [0], [1], [0, 0, 1, 1], [], []>} : vector<8x128xf32>, vector<128x128xf32>, vector<8x128xf32> -> vector<8x128xf32>
    %cst_8 = arith.constant 9.99999996E-13 : f32
    %9 = vector.broadcast %cst_8 : f32 to vector<8x128xf32>
    %10 = arith.addf %8, %9 : vector<8x128xf32>
    %11 = math.rsqrt %10 : vector<8x128xf32>
    %12 = arith.mulf %8, %11 : vector<8x128xf32>
    %cst_9 = arith.constant 1.000000e+00 : f32
    %13 = vector.broadcast %cst_9 : f32 to vector<8x128xf32>
    %14 = arith.addf %13, %8 : vector<8x128xf32>
    %15 = tpu.reciprocal %14 {approx = true} : vector<8x128xf32> -> vector<8x128xf32>
    %16 = arith.mulf %12, %15 : vector<8x128xf32>
    %17 = arith.mulf %5, %16 : vector<8x128xf32>
    %c0_10 = arith.constant 0 : index
    %c0_11 = arith.constant 0 : index
    %18 = vector.load %arg5[%c0_10, %c0_11] : memref<8x128xf32, #tpu.memory_space<vmem>>, vector<8x128xf32>
    tpu.vector_store %arg5[%c0_10, %c0_11], %17 {strides = array<i32>} : memref<8x128xf32, #tpu.memory_space<vmem>>, vector<8x128xf32>,
    return
  }
  func.func @transform_0(%arg0: i32) -> (i32, i32) {
    %c0_i32 = arith.constant 0 : i32
    %c0_i32_0 = arith.constant 0 : i32
    return %arg0, %c0_i32 : i32, i32
  }
  func.func @transform_1(%arg0: i32) -> (i32, i32) {
    %c0_i32 = arith.constant 0 : i32
    %c0_i32_0 = arith.constant 0 : i32
    %c0_i32_1 = arith.constant 0 : i32
    return %c0_i32, %c0_i32_0 : i32, i32
  }
  func.func @transform_2(%arg0: i32) -> (i32, i32) {
    %c0_i32 = arith.constant 0 : i32
    %c0_i32_0 = arith.constant 0 : i32
    %c0_i32_1 = arith.constant 0 : i32
    return %c0_i32, %c0_i32_0 : i32, i32
  }
  func.func @transform_3(%arg0: i32) -> (i32, i32) {
    %c0_i32 = arith.constant 0 : i32
    %c0_i32_0 = arith.constant 0 : i32
    %c0_i32_1 = arith.constant 0 : i32
    return %c0_i32, %c0_i32_0 : i32, i32
  }
  func.func @transform_4(%arg0: i32) -> (i32, i32) {
    %c0_i32 = arith.constant 0 : i32
    %c0_i32_0 = arith.constant 0 : i32
    return %arg0, %c0_i32 : i32, i32
  }
}

</mosaic_0001>

<bundles_post_ra>
// kernel: tpu_custom_call.1
= control target key start
LH: loop header
LB: loop body
LE: loop exit
PB: predicated region body
PF: predicated region fallthrough
CT: control target
= control target key end

     0   :  { %9 = vsyncpa [#allocation3], 0  ;;  %s1690_s0 = inlined_call_operand.hbm [shape: bf16[8,1296], index: 0, kind: input, shape index: {}]   ;;  %s1691_s1 = inlined_call_operand.hbm [shape: bf16[1296,128], index: 1, kind: input, shape index: {}]   ;;  %s1692_s2 = inlined_call_operand.vmem [shape: f32[1,128], index: 2, kind: input, shape index: {}]   ;;  %s1693_s3 = inlined_call_operand.hbm [shape: f32[128,128], index: 3, kind: input, shape index: {}]   ;;  %s1694_s4 = inlined_call_operand.hbm [shape: f32[8,128], index: 4, kind: output, shape index: {}]  }
   0x1   :  { %10 = vsyncpa [#allocation6], 0 }
   0x2   :  { %11 = vsyncpa [#allocation4], 0  ;;  %s1601_s15 = smov [#allocation5]   ;;  %s1507_s19 = scalar_lea.hbm %s1691_s1, 10368 }
   0x3   :  { %s27_s16 = sshll.u32 %s1601_s15, 4  ;;  %p1508_p0 = scmp.ne.s32.totalorder %s1691_s1, %s1507_s19  ;;  %s28_s16 = int_to_ptr.vmem [resolvable:$true] %s27_s16 }
   0x4   :  { %p1511_p1 = scmp.lt.u32.totalorder %s1507_s19, %s1691_s1 }
   0x6   :  { %p1513_p2 = pnand %p1511_p1, %p1508_p0 }
   0x8   :  { %1516 = shalt.err (!%p1513_p2)
}
   0x9   :  { %s1517_s24 = scalar_lea.vmem %s28_s16, 10368  ;;  %p1522_p4 = scmp.lt.s32.totalorder %s28_s16, %s28_s16 }
   0xa   :  { %p1518_p3 = scmp.ne.s32.totalorder %s28_s16, %s1517_s24  ;;  %p1523_p5 = scmp.lt.s32.totalorder %s1517_s24, %s1517_s24 }
   0xc   :  { %p1524_p6 = por %p1523_p5, %p1522_p4 }
   0xe   :  { %p1525_p7 = pnand %p1524_p6, %p1518_p3 }
  0x10   :  { %1528 = shalt.err (!%p1525_p7)
}
  0x11   :  { %s1602_s25 = smov 64   ;;  %s1603_s26 = smov 4  }
  0x12   :  { %33 = dma.hbm_to_vmem [thread:$0]  %s1691_s1, 10368, %s28_s16, [#allocation6], %s1602_s25, %s1602_s25, %s1603_s26  }
  0x13   :  { %s1604_s29 = smov [#allocation2]   ;;  %s1605_s5 = smov [#allocation7]  }
  0x14   :  { %s18_s30 = sshll.u32 %s1604_s29, 4  ;;  %s41_s6 = sshll.u32 %s1605_s5, 4  ;;  %s19_s30 = int_to_ptr.vmem [resolvable:$true] %s18_s30  ;;  %s42_s6 = int_to_ptr.vmem [resolvable:$true] %s41_s6 }
  0x15   :  { %s1529_s9 = scalar_lea.hbm %s1690_s0, 704 }
  0x16   :  { %p1530_p8 = scmp.ne.s32.totalorder %s1690_s0, %s1529_s9  ;;  %p1533_p9 = scmp.lt.u32.totalorder %s1529_s9, %s1690_s0 }
  0x18   :  { %p1535_p10 = pnand %p1533_p9, %p1530_p8 }
  0x1a   :  { %1538 = shalt.err (!%p1535_p10)
}
  0x1b   :  { %s1539_s1 = scalar_lea.vmem %s19_s30, 704  ;;  %p1544_p12 = scmp.lt.s32.totalorder %s19_s30, %s19_s30 }
  0x1c   :  { %p1540_p11 = scmp.ne.s32.totalorder %s19_s30, %s1539_s1  ;;  %p1545_p13 = scmp.lt.s32.totalorder %s1539_s1, %s1539_s1 }
  0x1e   :  { %p1546_p0 = por %p1545_p13, %p1544_p12 }
  0x20   :  { %p1547_p1 = pnand %p1546_p0, %p1540_p11 }
  0x22   :  { %1550 = shalt.err (!%p1547_p1)
}
  0x23   :  { %21 = dma.hbm_to_vmem [thread:$0]  %s1690_s0, 704, %s19_s30, [#allocation3]  }
  0x24   :  { %s1551_s18 = scalar_lea.hbm %s1693_s3, 2048 }
  0x25   :  { %p1552_p2 = scmp.ne.s32.totalorder %s1693_s3, %s1551_s18  ;;  %p1555_p3 = scmp.lt.u32.totalorder %s1551_s18, %s1693_s3 }
  0x27   :  { %p1557_p4 = pnand %p1555_p3, %p1552_p2 }
  0x29   :  { %1560 = shalt.err (!%p1557_p4)
}
  0x2a   :  { %s1561_s23 = scalar_lea.vmem %s42_s6, 2048  ;;  %p1566_p6 = scmp.lt.s32.totalorder %s42_s6, %s42_s6 }
  0x2b   :  { %p1562_p5 = scmp.ne.s32.totalorder %s42_s6, %s1561_s23  ;;  %p1567_p7 = scmp.lt.s32.totalorder %s1561_s23, %s1561_s23 }
  0x2d   :  { %p1568_p8 = por %p1567_p7, %p1566_p6 }
  0x2f   :  { %p1569_p9 = pnand %p1568_p8, %p1562_p5 }
  0x31   :  { %1572 = shalt.err (!%p1569_p9)
}
  0x32   :  { %s1606_s0 = smov 128   ;;  %s1607_s24 = smov 8  }
  0x33   :  { %47 = dma.hbm_to_vmem [thread:$0]  %s1693_s3, 2048, %s42_s6, [#allocation6], %s1606_s0, %s1606_s0, %s1607_s24  }
  0x34   :  { %1595 = dma.done.wait [#allocation3], 704  }
  0x35   :  { %1596 = vsyncadd [#allocation3], 4294966592 }
  0x36   :  { %1597 = dma.done.wait [#allocation6], 12416  }
  0x37   :  { %1598 = vsyncadd [#allocation6], 4294954880  ;;  %v1411_v0 = vld [vmem:[#allocation5 + $0x40] sm:$0xff]   ;;  %v1415_v4 = vld [vmem:[#allocation5 + $0x48] sm:$0xff]   ;;  %vm1609_vm0 = vmmov 0   ;;  %vm757_vm1 = vcmask 130048  }
  0x38   :  { %v1412_v1 = vld [vmem:[#allocation5] sm:$0xff]   ;;  %1206 = vmatprep.subr.bf16.mxu0 %v1411_v0  ;;  %v1416_v5 = vld [vmem:[#allocation5 + $0x8] sm:$0xff]   ;;  %v1419_v8 = vld [vmem:[#allocation5 + $0x50] sm:$0xff]  }
  0x39   :  { %v1413_v2 = vld [vmem:[#allocation5 + $0xc0] sm:$0xff]   ;;  %1207 = vmatpush3.bf16.msra.mxu0 %v1412_v1  ;;  %v1417_v6 = vld [vmem:[#allocation5 + $0xc8] sm:$0xff]   ;;  %v1420_v9 = vld [vmem:[#allocation5 + $0x10] sm:$0xff]  }
  0x3a   :  { %v1414_v3 = vld [vmem:[#allocation5 + $0x80] sm:$0xff]   ;;  %1228 = vmatprep.subr.bf16.mxu1 %v1413_v2  ;;  %1208 = vmatprep.subr.bf16.mxu0 %v1415_v4  ;;  %v1418_v7 = vld [vmem:[#allocation5 + $0x88] sm:$0xff]   ;;  %v1421_v10 = vld [vmem:[#allocation5 + $0xd0] sm:$0xff]  }
  0x3b   :  { %1229 = vmatpush3.bf16.msra.mxu1 %v1414_v3  ;;  %v1422_v11 = vld [vmem:[#allocation5 + $0x90] sm:$0xff]   ;;  %v1423_v12 = vld [vmem:[#allocation5 + $0x58] sm:$0xff]   ;;  %v1427_v16 = vld [vmem:[#allocation5 + $0x60] sm:$0xff]  }
  0x3c   :  { %1230 = vmatprep.subr.bf16.mxu1 %v1417_v6  ;;  %v1424_v13 = vld [vmem:[#allocation5 + $0x18] sm:$0xff]   ;;  %v1428_v17 = vld [vmem:[#allocation5 + $0x20] sm:$0xff]   ;;  %v1431_v20 = vld [vmem:[#allocation5 + $0x68] sm:$0xff]  }
  0x3d   :  { %1209 = vmatpush3.bf16.msra.mxu0 %v1416_v5  ;;  %v1425_v14 = vld [vmem:[#allocation5 + $0xd8] sm:$0xff]   ;;  %v1429_v18 = vld [vmem:[#allocation5 + $0xe0] sm:$0xff]   ;;  %v1432_v21 = vld [vmem:[#allocation5 + $0x28] sm:$0xff]  }
  0x3e   :  { %1210 = vmatprep.subr.bf16.mxu0 %v1419_v8  ;;  %v1426_v15 = vld [vmem:[#allocation5 + $0x98] sm:$0xff]   ;;  %v1430_v19 = vld [vmem:[#allocation5 + $0xa0] sm:$0xff]   ;;  %v1433_v22 = vld [vmem:[#allocation5 + $0xe8] sm:$0xff]  }
  0x3f   :  { %1231 = vmatpush3.bf16.msra.mxu1 %v1418_v7  ;;  %v1434_v23 = vld [vmem:[#allocation5 + $0xa8] sm:$0xff]   ;;  %v1435_v24 = vld [vmem:[#allocation5 + $0x70] sm:$0xff]   ;;  %v1439_v28 = vld [vmem:[#allocation5 + $0x78] sm:$0xff]  }
  0x40   :  { %1232 = vmatprep.subr.bf16.mxu1 %v1421_v10  ;;  %v1436_v25 = vld [vmem:[#allocation5 + $0x30] sm:$0xff]   ;;  %v1440_v29 = vld [vmem:[#allocation5 + $0x38] sm:$0xff]   ;;  %v1445_v35 = vld [vmem:[#allocation5 + $0x140] sm:$0xff]  }
  0x41   :  { %1211 = vmatpush3.bf16.msra.mxu0 %v1420_v9  ;;  %v1437_v26 = vld [vmem:[#allocation5 + $0xf0] sm:$0xff]   ;;  %v1441_v30 = vld [vmem:[#allocation5 + $0xf8] sm:$0xff]   ;;  %v1448_v39 = vld [vmem:[#allocation5 + $0x100] sm:$0xff]  }
  0x42   :  { %1212 = vmatprep.subr.bf16.mxu0 %v1423_v12  ;;  %v1438_v27 = vld [vmem:[#allocation5 + $0xb0] sm:$0xff]   ;;  %v1444_v34 = vld [vmem:[#allocation5 + $0xb8] sm:$0xff]   ;;  %v1449_v40 = vld [vmem:[#allocation5 + $0x1c0] sm:$0xff]  }
  0x43   :  { %1233 = vmatpush3.bf16.msra.mxu1 %v1422_v11  ;;  %v58_v31 = vld [vmem:[#allocation2] sm:$0xff]  ;;  %v59_v36 = vld [vmem:[#allocation2 + $0x8] sm:$0xff]  ;;  %v1451_v42 = vld [vmem:[#allocation5 + $0x148] sm:$0xff]  }
  0x44   :  { %1234 = vmatprep.subr.bf16.mxu1 %v1425_v14  ;;  %v1113_v32 = vcombine.low %v58_v31, %v58_v31  ;;  %v1114_v33 = vcombine.high %v58_v31, %v58_v31  ;;  %v1115_v37 = vcombine.low %v59_v36, %v59_v36  ;;  %v1116_v38 = vcombine.high %v59_v36, %v59_v36  ;;  %v1450_v41 = vld [vmem:[#allocation5 + $0x180] sm:$0xff]   ;;  %v1452_v43 = vld [vmem:[#allocation5 + $0x108] sm:$0xff]   ;;  %v1455_v46 = vld [vmem:[#allocation5 + $0x150] sm:$0xff]  }
  0x45   :  { %1213 = vmatpush3.bf16.msra.mxu0 %v1424_v13  ;;  %v1453_v44 = vld [vmem:[#allocation5 + $0x1c8] sm:$0xff]   ;;  %v1456_v47 = vld [vmem:[#allocation5 + $0x110] sm:$0xff]   ;;  %v1459_v50 = vld [vmem:[#allocation5 + $0x158] sm:$0xff]  }
  0x46   :  { %1214 = vmatprep.subr.bf16.mxu0 %v1427_v16  ;;  %793 = vmatprep.mubr.bf16.mxu0 %v1114_v33  ;;  %v1454_v45 = vld [vmem:[#allocation5 + $0x188] sm:$0xff]   ;;  %v1457_v48 = vld [vmem:[#allocation5 + $0x1d0] sm:$0xff]   ;;  %v1460_v51 = vld [vmem:[#allocation5 + $0x118] sm:$0xff]  }
  0x47   :  { %1235 = vmatpush3.bf16.msra.mxu1 %v1426_v15  ;;  %833 = vmatprep.mubr.bf16.mxu1 %v1116_v38  ;;  %v1458_v49 = vld [vmem:[#allocation5 + $0x190] sm:$0xff]   ;;  %v1461_v52 = vld [vmem:[#allocation5 + $0x1d8] sm:$0xff]   ;;  %v1463_v54 = vld [vmem:[#allocation5 + $0x160] sm:$0xff]   ;;  %v1608_v15 = vmov 0.0  }
  0x48   :  { %1236 = vmatprep.subr.bf16.mxu1 %v1429_v18  ;;  %v1462_v53 = vld [vmem:[#allocation5 + $0x198] sm:$0xff]   ;;  %v1464_v55 = vld [vmem:[#allocation5 + $0x120] sm:$0xff]   ;;  %v1467_v58 = vld [vmem:[#allocation5 + $0x168] sm:$0xff]  }
  0x49   :  { %1215 = vmatpush3.bf16.msra.mxu0 %v1428_v17  ;;  %v1465_v56 = vld [vmem:[#allocation5 + $0x1e0] sm:$0xff]   ;;  %v1468_v59 = vld [vmem:[#allocation5 + $0x128] sm:$0xff]   ;;  %v1471_v62 = vld [vmem:[#allocation5 + $0x170] sm:$0xff]  }
  0x4a   :  { %1216 = vmatprep.subr.bf16.mxu0 %v1431_v20  ;;  %v1466_v57 = vld [vmem:[#allocation5 + $0x1a0] sm:$0xff]   ;;  %v1469_v60 = vld [vmem:[#allocation5 + $0x1e8] sm:$0xff]   ;;  %v1472_v63 = vld [vmem:[#allocation5 + $0x130] sm:$0xff]  }
  0x4b   :  { %1237 = vmatpush3.bf16.msra.mxu1 %v1430_v19  ;;  %v1470_v61 = vld [vmem:[#allocation5 + $0x1a8] sm:$0xff]   ;;  %v1473_v0 = vld [vmem:[#allocation5 + $0x1f0] sm:$0xff]   ;;  %v1475_v2 = vld [vmem:[#allocation5 + $0x178] sm:$0xff]  }
  0x4c   :  { %1238 = vmatprep.subr.bf16.mxu1 %v1433_v22  ;;  %v1474_v1 = vld [vmem:[#allocation5 + $0x1b0] sm:$0xff]   ;;  %v1476_v3 = vld [vmem:[#allocation5 + $0x138] sm:$0xff]   ;;  %v60_v5 = vld [vmem:[#allocation2 + $0x10] sm:$0xff] }
  0x4d   :  { %1217 = vmatpush3.bf16.msra.mxu0 %v1432_v21  ;;  %v1477_v4 = vld [vmem:[#allocation5 + $0x1f8] sm:$0xff]   ;;  %v1117_v6 = vcombine.low %v60_v5, %v60_v5  ;;  %v1118_v7 = vcombine.high %v60_v5, %v60_v5  ;;  %v1481_v9 = vld [vmem:[#allocation5 + $0x240] sm:$0xff]   ;;  %v61_v10 = vld [vmem:[#allocation2 + $0x18] sm:$0xff] }
  0x4e   :  { %1218 = vmatprep.subr.bf16.mxu0 %v1435_v24  ;;  %v1480_v8 = vld [vmem:[#allocation5 + $0x1b8] sm:$0xff]   ;;  %v1119_v11 = vcombine.low %v61_v10, %v61_v10  ;;  %v1120_v12 = vcombine.high %v61_v10, %v61_v10  ;;  %v1484_v13 = vld [vmem:[#allocation5 + $0x200] sm:$0xff]   ;;  %v1485_v14 = vld [vmem:[#allocation5 + $0x248] sm:$0xff]  }
  0x4f   :  { %1239 = vmatpush3.bf16.msra.mxu1 %v1434_v23  ;;  %v1486_v16 = vld [vmem:[#allocation5 + $0x208] sm:$0xff]   ;;  %v1487_v17 = vld [vmem:[#allocation5 + $0x250] sm:$0xff]   ;;  %v1489_v19 = vld [vmem:[#allocation5 + $0x258] sm:$0xff]  }
  0x50   :  { %1240 = vmatprep.subr.bf16.mxu1 %v1437_v26  ;;  %v1488_v18 = vld [vmem:[#allocation5 + $0x210] sm:$0xff]   ;;  %v1490_v20 = vld [vmem:[#allocation5 + $0x218] sm:$0xff]   ;;  %v1491_v21 = vld [vmem:[#allocation5 + $0x260] sm:$0xff]  }
  0x51   :  { %1219 = vmatpush3.bf16.msra.mxu0 %v1436_v25  ;;  %v1492_v22 = vld [vmem:[#allocation5 + $0x220] sm:$0xff]   ;;  %v1493_v23 = vld [vmem:[#allocation5 + $0x268] sm:$0xff]   ;;  %v62_v25 = vld [vmem:[#allocation2 + $0x20] sm:$0xff] }
  0x52   :  { %1220 = vmatprep.subr.bf16.mxu0 %v1439_v28  ;;  %v1499_v24 = vld [vmem:[#allocation5 + $0x280] sm:$0xff]   ;;  %v1122_v26 = vcombine.high %v62_v25, %v62_v25  ;;  %v1494_v28 = vld [vmem:[#allocation5 + $0x228] sm:$0xff]   ;;  %v1497_v31 = vld [vmem:[#allocation5 + $0x278] sm:$0xff]   ;;  %v1121_v33 = vcombine.low %v62_v25, %v62_v25 }
  0x53   :  { %1241 = vmatpush3.bf16.msra.mxu1 %v1438_v27  ;;  %v1502_v27 = vld [vmem:[#allocation2 + $0x28] ss:$0 sps:$4 sm:$0xff]  }
  0x54   :  { %1242 = vmatprep.subr.bf16.mxu1 %v1441_v30  ;;  %v1496_v30 = vld [vmem:[#allocation5 + $0x230] sm:$0xff]   ;;  %v1004_v36 = vld [vmem:[#allocation7 + $0x10] sm:$0xff] }
  0x55   :  { %1221 = vmatpush3.bf16.msra.mxu0 %v1440_v29  ;;  %v1495_v29 = vld [vmem:[#allocation5 + $0x270] sm:$0xff]  }
  0x56   :  { %1250 = vmatprep.subr.bf16.mxu0 %v1445_v35  ;;  %v1003_v35 = vld [vmem:[#allocation7 + $0x8] sm:$0xff] }
  0x57   :  { %1243 = vmatpush3.bf16.msra.mxu1 %v1444_v34  ;;  %v1002_v34 = vld [vmem:[#allocation7] sm:$0xff] }
  0x58   :  { %794 = vmatmul.mubr.bf16.vlgmr.msra.gmra.mrb[0].mxu0 %v1113_v32  ;;  %1272 = vmatprep.subr.bf16.mxu1 %v1449_v40  ;;  %v1498_v32 = vld [vmem:[#allocation5 + $0x238] sm:$0xff]   ;;  %v1377_v38 = vpack.c.bf16 %v1003_v35, %v1002_v34 }
  0x59   :  { %1251 = vmatpush3.bf16.msra.mxu0 %v1448_v39  ;;  %873 = vmatprep.mubr.bf16.mxu0 %v1118_v7  ;;  %v1005_v39 = vld [vmem:[#allocation7 + $0x18] sm:$0xff] }
  0x5a   :  { %834 = vmatmul.mubr.bf16.vlgmr.msra.gmra.mrb[0].mxu1 %v1115_v37  ;;  %1252 = vmatprep.subr.bf16.mxu0 %v1451_v42  ;;  %v1610_v37 = vmov 0.0|0.0   ;;  %v1380_v40 = vpack.c.bf16 %v1005_v39, %v1004_v36  ;;  %v1007_v42 = vld [vmem:[#allocation7 + $0x28] sm:$0xff] }
  0x5b   :  { %1273 = vmatpush3.bf16.msra.mxu1 %v1450_v41  ;;  %913 = vmatprep.mubr.bf16.mxu1 %v1120_v12  ;;  %v1006_v41 = vld [vmem:[#allocation7 + $0x20] sm:$0xff] }
  0x5c   :  { %1274 = vmatprep.subr.bf16.mxu1 %v1453_v44  ;;  %v1008_v44 = vld [vmem:[#allocation7 + $0x30] sm:$0xff] }
  0x5d   :  { %1253 = vmatpush3.bf16.msra.mxu0 %v1452_v43  ;;  %v1383_v43 = vpack.c.bf16 %v1007_v42, %v1006_v41 }
  0x5e   :  { %1254 = vmatprep.subr.bf16.mxu0 %v1455_v46 }
  0x5f   :  { %1275 = vmatpush3.bf16.msra.mxu1 %v1454_v45  ;;  %v1009_v45 = vld [vmem:[#allocation7 + $0x38] sm:$0xff] }
  0x60   :  { %1276 = vmatprep.subr.bf16.mxu1 %v1457_v48  ;;  %v1386_v46 = vpack.c.bf16 %v1009_v45, %v1008_v44  ;;  %v1011_v48 = vld [vmem:[#allocation7 + $0x48] sm:$0xff] }
  0x61   :  { %1255 = vmatpush3.bf16.msra.mxu0 %v1456_v47  ;;  %v1010_v47 = vld [vmem:[#allocation7 + $0x40] sm:$0xff] }
  0x62   :  { %1256 = vmatprep.subr.bf16.mxu0 %v1459_v50  ;;  %v1012_v50 = vld [vmem:[#allocation7 + $0x50] sm:$0xff] }
  0x63   :  { %1277 = vmatpush3.bf16.msra.mxu1 %v1458_v49  ;;  %v1389_v49 = vpack.c.bf16 %v1011_v48, %v1010_v47 }
  0x64   :  { %1278 = vmatprep.subr.bf16.mxu1 %v1461_v52 }
  0x65   :  { %1257 = vmatpush3.bf16.msra.mxu0 %v1460_v51  ;;  %v1013_v51 = vld [vmem:[#allocation7 + $0x58] sm:$0xff] }
  0x66   :  { %1258 = vmatprep.subr.bf16.mxu0 %v1463_v54  ;;  %v1392_v52 = vpack.c.bf16 %v1013_v51, %v1012_v50  ;;  %v1015_v54 = vld [vmem:[#allocation7 + $0x68] sm:$0xff] }
  0x67   :  { %1279 = vmatpush3.bf16.msra.mxu1 %v1462_v53  ;;  %v1014_v53 = vld [vmem:[#allocation7 + $0x60] sm:$0xff] }
  0x68   :  { %1280 = vmatprep.subr.bf16.mxu1 %v1465_v56  ;;  %v1016_v56 = vld [vmem:[#allocation7 + $0x70] sm:$0xff] }
  0x69   :  { %1259 = vmatpush3.bf16.msra.mxu0 %v1464_v55  ;;  %v1395_v55 = vpack.c.bf16 %v1015_v54, %v1014_v53 }
  0x6a   :  { %1260 = vmatprep.subr.bf16.mxu0 %v1467_v58 }
  0x6b   :  { %1281 = vmatpush3.bf16.msra.mxu1 %v1466_v57  ;;  %v1017_v57 = vld [vmem:[#allocation7 + $0x78] sm:$0xff] }
  0x6c   :  { %1282 = vmatprep.subr.bf16.mxu1 %v1469_v60  ;;  %v1398_v58 = vpack.c.bf16 %v1017_v57, %v1016_v56  ;;  %v1112_v60 = vld [vmem:[%s1692_s2] ss:$0 sm:$0xff]  ;;  %s1611_s2 = smov [#allocation8]  }
  0x6d   :  { %1261 = vmatpush3.bf16.msra.mxu0 %v1468_v59  ;;  %s1102_s28 = sshll.u32 %s1611_s2, 4  ;;  %s1103_s28 = int_to_ptr.vmem [resolvable:$true] %s1102_s28 }
  0x6e   :  { %1262 = vmatprep.subr.bf16.mxu0 %v1471_v62  ;;  %s1573_s29 = scalar_lea.vmem %s1103_s28, 128  ;;  %p1578_p11 = scmp.lt.s32.totalorder %s1103_s28, %s1103_s28 }
  0x6f   :  { %1283 = vmatpush3.bf16.msra.mxu1 %v1470_v61  ;;  %p1574_p10 = scmp.ne.s32.totalorder %s1103_s28, %s1573_s29  ;;  %p1579_p12 = scmp.lt.s32.totalorder %s1573_s29, %s1573_s29 }
  0x70   :  { %1284 = vmatprep.subr.bf16.mxu1 %v1473_v0 }
  0x71   :  { %1263 = vmatpush3.bf16.msra.mxu0 %v1472_v63  ;;  %p1580_p13 = por %p1579_p12, %p1578_p11 }
  0x72   :  { %1264 = vmatprep.subr.bf16.mxu0 %v1475_v2 }
  0x73   :  { %1285 = vmatpush3.bf16.msra.mxu1 %v1474_v1  ;;  %p1581_p0 = pnand %p1580_p13, %p1574_p10 }
  0x74   :  { %1286 = vmatprep.subr.bf16.mxu1 %v1477_v4 }
  0x75   :  { %1265 = vmatpush3.bf16.msra.mxu0 %v1476_v3 }
  0x76   :  { %1294 = vmatprep.subr.bf16.mxu0 %v1481_v9 }
  0x77   :  { %1287 = vmatpush3.bf16.msra.mxu1 %v1480_v8 }
  0x78   :  { %874 = vmatmul.mubr.bf16.vlgmr.msra.gmra.mrb[4].mxu0 %v1117_v6  ;;  %1335 = vmatprep.subr.bf16.mxu1 %v1608_v15 }
  0x79   :  { %1295 = vmatpush3.bf16.msra.mxu0 %v1484_v13  ;;  %953 = vmatprep.mubr.bf16.mxu0 %v1122_v26 }
  0x7a   :  { %914 = vmatmul.mubr.bf16.vlgmr.msra.gmra.mrb[4].mxu1 %v1119_v11  ;;  %1296 = vmatprep.subr.bf16.mxu0 %v1485_v14 }
  0x7b   :  { %1337 = vmatprep.mubr.msk.bf16.mxu1 %vm1609_vm0, %v1608_v15  ;;  %1336 = vmatpush3.bf16.msra.mxu1 %v1499_v24 }
  0x7c   :  { %1376 = vmatprep.subr.bf16.mxu1 %v1610_v37 }
  0x7d   :  { %1297 = vmatpush3.bf16.msra.mxu0 %v1486_v16 }
  0x7e   :  { %1298 = vmatprep.subr.bf16.mxu0 %v1487_v17 }
  0x81   :  { %1299 = vmatpush3.bf16.msra.mxu0 %v1488_v18 }
  0x82   :  { %1300 = vmatprep.subr.bf16.mxu0 %v1489_v19  ;;  %1338 = vmatmul.mubr.msk.bf16.vlgmr.msra.gmra.mrb[8].mxu1 %vm757_vm1, %v1502_v27 }
  0x83   :  { %1373 = vmatprep.mubr.msk.f32.mxu1 %vm1609_vm0, %v1608_v15  ;;  %1378 = vmatpush3.bf16.msra.mxu1 %v1377_v38 }
  0x84   :  { %1379 = vmatprep.subr.bf16.mxu1 %v1610_v37 }
  0x85   :  { %1301 = vmatpush3.bf16.msra.mxu0 %v1490_v20 }
  0x86   :  { %1302 = vmatprep.subr.bf16.mxu0 %v1491_v21 }
  0x87   :  { %1381 = vmatpush3.bf16.msra.mxu1 %v1380_v40 }
  0x88   :  { %1382 = vmatprep.subr.bf16.mxu1 %v1610_v37 }
  0x89   :  { %1303 = vmatpush3.bf16.msra.mxu0 %v1492_v22 }
  0x8a   :  { %1304 = vmatprep.subr.bf16.mxu0 %v1493_v23 }
  0x8b   :  { %1384 = vmatpush3.bf16.msra.mxu1 %v1383_v43 }
  0x8c   :  { %1385 = vmatprep.subr.bf16.mxu1 %v1610_v37 }
  0x8d   :  { %1305 = vmatpush3.bf16.msra.mxu0 %v1494_v28 }
  0x8e   :  { %1306 = vmatprep.subr.bf16.mxu0 %v1495_v29 }
  0x8f   :  { %1387 = vmatpush3.bf16.msra.mxu1 %v1386_v46 }
  0x90   :  { %1388 = vmatprep.subr.bf16.mxu1 %v1610_v37 }
  0x91   :  { %1307 = vmatpush3.bf16.msra.mxu0 %v1496_v30 }
  0x92   :  { %1308 = vmatprep.subr.bf16.mxu0 %v1497_v31 }
  0x93   :  { %1390 = vmatpush3.bf16.msra.mxu1 %v1389_v49 }
  0x94   :  { %1391 = vmatprep.subr.bf16.mxu1 %v1610_v37 }
  0x95   :  { %1309 = vmatpush3.bf16.msra.mxu0 %v1498_v32 }
  0x97   :  { %1393 = vmatpush3.bf16.msra.mxu1 %v1392_v52 }
  0x98   :  { %954 = vmatmul.mubr.bf16.vlgmr.msra.gmra.mrb[8].mxu0 %v1121_v33  ;;  %1394 = vmatprep.subr.bf16.mxu1 %v1610_v37 }
  0x9b   :  { %1396 = vmatpush3.bf16.msra.mxu1 %v1395_v55 }
  0x9c   :  { %1397 = vmatprep.subr.bf16.mxu1 %v1610_v37 }
  0x9f   :  { %1399 = vmatpush3.bf16.msra.mxu1 %v1398_v58 }
 0x12b   :  { %v1222_v59 = vpop.f32.mrb[0].mxu0 }
 0x12c   :  { %v1223_v61 = vpop.f32.mrb[1].mxu0 }
 0x12d   :  { %v1224_v62 = vadd.f32 %v1223_v61, %v1222_v59  ;;  %v1225_v63 = vpop.f32.mrb[2].mxu0  ;;  %v1244_v0 = vpop.f32.mrb[0].mxu1 }
 0x12e   :  { %v1226_v1 = vpop.f32.mrb[3].mxu0  ;;  %v1245_v2 = vpop.f32.mrb[1].mxu1 }
 0x12f   :  { %v796_v3 = vadd.f32 %v1224_v62, %v1112_v60  ;;  %v1246_v4 = vadd.f32 %v1245_v2, %v1244_v0  ;;  %v1247_v5 = vpop.f32.mrb[2].mxu1 }
 0x130   :  { %v1248_v6 = vpop.f32.mrb[3].mxu1 }
 0x131   :  { %v836_v7 = vadd.f32 %v1246_v4, %v796_v3 }
 0x14b   :  { %v1266_v8 = vpop.f32.mrb[4].mxu0 }
 0x14c   :  { %v1267_v9 = vpop.f32.mrb[5].mxu0 }
 0x14d   :  { %v1268_v10 = vadd.f32 %v1267_v9, %v1266_v8  ;;  %v1269_v11 = vpop.f32.mrb[6].mxu0  ;;  %v1288_v12 = vpop.f32.mrb[4].mxu1 }
 0x14e   :  { %v1270_v13 = vpop.f32.mrb[7].mxu0  ;;  %v1289_v15 = vpop.f32.mrb[5].mxu1 }
 0x14f   :  { %v876_v14 = vadd.f32 %v1268_v10, %v836_v7  ;;  %v1290_v16 = vadd.f32 %v1289_v15, %v1288_v12  ;;  %v1291_v17 = vpop.f32.mrb[6].mxu1 }
 0x150   :  { %v1292_v18 = vpop.f32.mrb[7].mxu1 }
 0x151   :  { %v916_v19 = vadd.f32 %v1290_v16, %v876_v14 }
 0x155   :  { %v995_v20 = vpop.f32.mrb[8].mxu1 }
 0x156   :  { %v1339_v21 = vpop.f32.mrb[9].mxu1 }
 0x157   :  { %v998_v22 = vpop.f32.mrb[10].mxu1 }
 0x158   :  { %v1340_v23 = vpop.f32.mrb[11].mxu1 }
 0x16b   :  { %v1310_v24 = vpop.f32.mrb[8].mxu0 }
 0x16c   :  { %v1311_v25 = vpop.f32.mrb[9].mxu0 }
 0x16d   :  { %v1312_v26 = vadd.f32 %v1311_v25, %v1310_v24  ;;  %v1313_v27 = vpop.f32.mrb[10].mxu0 }
 0x16e   :  { %v1314_v28 = vpop.f32.mrb[11].mxu0 }
 0x16f   :  { %v956_v29 = vadd.f32 %v1312_v26, %v916_v19 }
 0x171   :  { %v996_v30 = vadd.f32 %v995_v20, %v956_v29 }
 0x173   :  { %v1001_v31 = vmul.f32 %v996_v30, %v996_v30 }
 0x175   :  { %1374 = vmatmul.mubr.f32.vlgmr.msra.gmra.mrb[12].mxu1 %v1001_v31 }
 0x248   :  { %v1084_v32 = vpop.f32.mrb[12].mxu1 }
 0x249   :  { %v1088_v33 = vadd.f32 1e-12, %v1084_v32  ;;  %v1091_v34 = vadd.f32 1.0, %v1084_v32  ;;  %v1375_v35 = vpop.f32.mrb[13].mxu1 }
 0x24b   :  { %1503 = vrsqrt.f32 %v1088_v33 }
 0x24c   :  { %1505 = vrcp.f32 %v1091_v34 }
 0x255   :  { %v1504_v36 = vpop.eup %1503 }
 0x256   :  { %v1090_v37 = vmul.f32 %v1504_v36, %v1084_v32  ;;  %v1506_v38 = vpop.eup %1505 }
 0x258   :  { %v1093_v39 = vmul.f32 %v1506_v38, %v1090_v37 }
 0x25a   :  { %v1094_v40 = vmul.f32 %v1093_v39, %v996_v30 }
 0x25c   :  { %1095 = vst [vmem:[#allocation8] sm:$0xff] %v1094_v40 }
 0x25d   :  { %1584 = shalt.err (!%p1581_p0)
}
 0x25e   :  { %s1585_s6 = scalar_lea.hbm %s1694_s4, 128 }
 0x25f   :  { %p1586_p1 = scmp.ne.s32.totalorder %s1694_s4, %s1585_s6  ;;  %p1589_p2 = scmp.lt.u32.totalorder %s1585_s6, %s1694_s4 }
 0x261   :  { %p1591_p3 = pnand %p1589_p2, %p1586_p1 }
 0x263   :  { %1594 = shalt.err (!%p1591_p3)
}
 0x264   :  { %1105 = dma.vmem_to_hbm [thread:$0]  %s1103_s28, 128, %s1694_s4, [#allocation4]  }
 0x265   :  { %1599 = dma.done.wait [#allocation4], 128  }
 0x266   :  { %1600 = vsyncadd [#allocation4], 4294967168 }
 0x267   :  { %1109 = vsyncpa [#allocation3], 1 }
 0x268   :  { %1110 = vsyncpa [#allocation6], 1 }
 0x269   :  { %1111 = vsyncpa [#allocation4], 1 }

</bundles_post_ra>
